<compile_context>
chip_gen: v7x
topology: tpu7x:2x2x1
jax: 0.10.0
libtpu: 0.0.40
codegen_flags: <defaults>
</compile_context>

<pallas_src>
import itertools

import numpy as np
import jax
import jax.numpy as jnp
from jax.experimental import pallas as pl
from jax.experimental.pallas import tpu as pltpu

LN_EPS = 1e-5


# ----- static hyperedge generation (mirrors generate_static_hyperedges) --------------
def build_hyperedges(num_experts, strategy):
    node_indices, hyperedge_ids = [], []
    eid = 0
    if strategy == "all_pairs":
        if num_experts >= 2:
            for i, j in itertools.combinations(range(num_experts), 2):
                node_indices += [i, j]
                hyperedge_ids += [eid, eid]
                eid += 1
    elif strategy == "all_triplets":
        if num_experts >= 3:
            for i, j, k in itertools.combinations(range(num_experts), 3):
                node_indices += [i, j, k]
                hyperedge_ids += [eid, eid, eid]
                eid += 1
    elif strategy == "all":
        if num_experts > 0:
            node_indices += list(range(num_experts))
            hyperedge_ids += [0] * num_experts
            eid = 1
    else:
        raise ValueError(strategy)
    return np.asarray(node_indices, np.int64), np.asarray(hyperedge_ids, np.int64), eid


def build_prop_matrix(num_experts, strategy):
    """A = D^{-1} H B^{-1} H^T (PyG HypergraphConv propagation, unit edge weights).
    Returns None when the strategy yields no hyperedges (module then skips the GNN stack)."""
    nodes, edges, n_edges = build_hyperedges(num_experts, strategy)
    if n_edges == 0:
        return None
    H = np.zeros((num_experts, n_edges), np.float32)
    H[nodes, edges] = 1.0
    d = H.sum(axis=1)
    Dinv = np.where(d > 0, 1.0 / np.maximum(d, 1e-30), 0.0)
    bdeg = H.sum(axis=0)
    Binv = np.where(bdeg > 0, 1.0 / np.maximum(bdeg, 1e-30), 0.0)
    return (Dinv[:, None] * H) @ (Binv[:, None] * H.T)  # (E, E)


# ----- in-kernel helpers --------------------------------------------------------------
def _erf(x):
    # Abramowitz & Stegun 7.1.26 polynomial erf (max abs err ~1.5e-7, i.e. f32 precision).
    # TODO(synk): pl.reciprocal(approx=True) for t and a sign-bit trick would shave a couple of
    # VALU slots but must be re-validated against the 3e-4 tolerance before adoption.
    a1, a2, a3, a4, a5 = 0.254829592, -0.284496736, 1.421413741, -1.453152027, 1.061405429
    p = 0.3275911
    s = jnp.where(x >= 0.0, 1.0, -1.0)
    ax = jnp.abs(x)
    t = 1.0 / (1.0 + p * ax)
    poly = (((((a5 * t + a4) * t) + a3) * t + a2) * t + a1) * t
    return s * (1.0 - poly * jnp.exp(-ax * ax))


def _gelu_exact(x):
    return 0.5 * x * (1.0 + _erf(x * 0.7071067811865476))


def make_fused_kernel(n_experts):
    """All active heads fused:
         z   = sum_e x_e @ W_e + b_cat                   # (tn, H*D), one wide MXU output
         g   = GELU(z)                                   # elementwise on the fused lanes
         mu  = g @ S              (block-diag 1/D)       # per-head mean, via MXU
         var = ((g-mu)^2) @ S                            # per-head biased variance, via MXU
         out = ((g-mu)*rsqrt(var+eps)) @ P + beta_out    # gamma*softmax-weight scale + head sum
    """

    def kernel(*refs):
        x_refs = refs[:n_experts]
        w_ref, b_ref, s_ref, p_ref, bo_ref, o_ref = refs[n_experts:]

        z = jnp.dot(x_refs[0][...], w_ref[0], preferred_element_type=jnp.float32)
        for e in range(1, n_experts):                      # unrolled at trace time; MXU has slack
            z = z + jnp.dot(x_refs[e][...], w_ref[e], preferred_element_type=jnp.float32)
        z = z + b_ref[...]

        g = _gelu_exact(z)                                 # fused (tn, H*D) lanes

        mu = jnp.dot(g, s_ref[...], preferred_element_type=jnp.float32)
        c = g - mu
        var = jnp.dot(c * c, s_ref[...], preferred_element_type=jnp.float32)
        zn = c * jax.lax.rsqrt(var + LN_EPS)

        out = jnp.dot(zn, p_ref[...], preferred_element_type=jnp.float32) + bo_ref[...]
        o_ref[...] = out.astype(o_ref.dtype)

    return kernel


# ----- affine folding of one HGNNExpertCoupler ----------------------------------------
def fold_coupler_affine(Ws, bs, Wc, bc, A, E, D):
    """Fold (HypergraphConv stack -> mean over experts -> combiner Linear) into one affine map
    acting on the row-flattened (E*D,) expert features:  z = x_flat @ W_total + b_total."""
    EK = E * D
    if A is None or Ws.shape[0] == 0:
        M = jnp.eye(EK, dtype=jnp.float32)
        c = jnp.zeros((1, EK), jnp.float32)
    else:
        At = jnp.asarray(A, jnp.float32).T
        M = jnp.kron(At, Ws[0].astype(jnp.float32))              # vec_row(A X W) = x @ kron(A^T, W)
        c = jnp.tile(bs[0].astype(jnp.float32), (1, E))
        for l in range(1, Ws.shape[0]):
            Kl = jnp.kron(At, Ws[l].astype(jnp.float32))
            M = M @ Kl
            c = c @ Kl + jnp.tile(bs[l].astype(jnp.float32), (1, E))
    Wc_eff = jnp.tile(Wc.astype(jnp.float32), (E, 1)) / float(E)  # mean over experts + Linear
    W_total = M @ Wc_eff                                          # (E*D, D)
    b_total = c @ Wc_eff + bc.astype(jnp.float32)                 # (1, D)
    return W_total, b_total


# ----- wrapper ------------------------------------------------------------------------
def _round_up(a, m):
    return -(-a // m) * m


def triple_hypergraph_coupler(all_expert_outputs, ghost_activation_levels, params, config,
                              *, tile_n=1024):
    num_primary = config["num_experts"]
    D = config["embed_dim"]
    strategy = config["static_hyperedge_strategy"]

    primary = list(all_expert_outputs[:num_primary])
    ghosts = list(all_expert_outputs[num_primary:])
    levels = np.asarray(ghost_activation_levels, np.float32)
    # Host-side data-dependent branching, mirroring the PyTorch python `if level > 0.1` loops.
    # NOTE: this makes the head set / compiled kernel depend on the activation pattern (retrace
    # per pattern), exactly like the torch module's python-level control flow.
    active_ghosts = [g for g, lv in zip(ghosts, levels) if float(lv) > 0.1]

    B, L, _ = primary[0].shape
    N = B * L
    Ep, Eg = num_primary, len(active_ghosts)
    experts = primary + active_ghosts
    E_tot = Ep + Eg

    wmix = jax.nn.softmax(params["coupling_weights"].astype(jnp.float32))  # (3,)

    # Active heads: (softmax index, coupler params, global expert indices feeding the head).
    heads = [(0, params["primary"], list(range(Ep)))]
    if Eg >= 2:
        heads.append((1, params["ghost"], list(range(Ep, E_tot))))
    if Eg >= 1:                                   # at least one active ghost -> mixed coupler runs
        heads.append((2, params["mixed"], list(range(E_tot))))
    # Skipped branches contribute exactly zero, matching torch.zeros_like in the module.
    H = len(heads)
    HD = H * D

    # --- fold every head and build the fused, per-expert weight blocks ------------------
    W_blocks = jnp.zeros((E_tot, D, HD), jnp.float32)   # expert e -> columns of all heads it feeds
    b_parts = []
    P = jnp.zeros((HD, D), jnp.float32)                 # gamma*softmax scale + head-sum projection
    beta_out = jnp.zeros((1, D), jnp.float32)
    for h, (widx, p, e_idx) in enumerate(heads):
        E_c = len(e_idx)
        # TODO(synk): the torch module reuses its __init__-time hypergraph even when the number of
        # stacked (active) experts differs from the configured count, which indexes out of range in
        # PyG; here the propagation matrix is built for the actual stacked expert count.
        A = build_prop_matrix(E_c, strategy)
        Wt, bt = fold_coupler_affine(p["Ws"], p["bs"], p["Wc"], p["bc"], A, E_c, D)
        for pos, e in enumerate(e_idx):
            W_blocks = W_blocks.at[e, :, h * D:(h + 1) * D].set(Wt[pos * D:(pos + 1) * D, :])
        b_parts.append(bt)
        P = P.at[h * D:(h + 1) * D, :].set(jnp.diag(p["gamma"][0].astype(jnp.float32) * wmix[widx]))
        beta_out = beta_out + p["beta"].astype(jnp.float32) * wmix[widx]
    b_cat = jnp.concatenate(b_parts, axis=-1)                                  # (1, H*D)
    # Block-diagonal mean selector: per-head mean broadcast across that head's D columns.
    S = jnp.kron(jnp.eye(H, dtype=jnp.float32), jnp.full((D, D), 1.0 / D, jnp.float32))

    # --- row tiling (big tiles; per-step overhead amortised; everything fits VMEM easily) ----
    tn = min(tile_n, _round_up(N, 8))
    n_tiles = -(-N // tn)
    N_pad = n_tiles * tn
    # TODO(synk): on v7x (2 TensorCores) prefer an even, balanced tile count when n_tiles is tiny;
    # for large N the "parallel" axis already has plenty of steps. Also tile the K (=E*D) axis with
    # a reduction grid dim if embed_dim/expert counts ever push resident weights near VMEM limits.

    x_list = []
    for x in experts:                               # no stacked slab: each expert read directly
        xe = x.reshape(N, D).astype(jnp.float32)
        if N_pad != N:
            xe = jnp.pad(xe, ((0, N_pad - N), (0, 0)))  # zero-padded tail rows (discarded below)
        x_list.append(xe)

    flops = 2 * N_pad * (E_tot * D * HD + 2 * HD * HD + HD * D)
    bytes_accessed = 4 * (N_pad * E_tot * D + N_pad * D
                          + E_tot * D * HD + 2 * HD * HD + 2 * HD * D + HD + D)
    cost = pl.CostEstimate(flops=int(flops), transcendentals=int(N_pad * HD),
                           bytes_accessed=int(bytes_accessed))

    in_specs = (
        [pl.BlockSpec((tn, D), lambda i: (i, 0)) for _ in range(E_tot)]    # expert row tiles
        + [pl.BlockSpec((E_tot, D, HD), lambda i: (0, 0, 0)),              # fused weights (resident)
           pl.BlockSpec((1, HD), lambda i: (0, 0)),                        # fused bias
           pl.BlockSpec((HD, HD), lambda i: (0, 0)),                       # mean/var selector
           pl.BlockSpec((HD, D), lambda i: (0, 0)),                        # gamma*w + head-sum proj
           pl.BlockSpec((1, D), lambda i: (0, 0))]                         # summed beta*w
    )

    out = pl.pallas_call(
        make_fused_kernel(E_tot),
        out_shape=jax.ShapeDtypeStruct((N_pad, D), jnp.float32),
        grid_spec=pltpu.PrefetchScalarGridSpec(
            num_scalar_prefetch=0,
            grid=(n_tiles,),
            in_specs=in_specs,
            out_specs=pl.BlockSpec((tn, D), lambda i: (i, 0)),
        ),
        compiler_params=pltpu.CompilerParams(dimension_semantics=("parallel",)),
        cost_estimate=cost,
    )(*x_list, W_blocks, b_cat, S, P, beta_out)

    return out[:N].reshape(B, L, D)


# ----- pure-JAX reference for validation ----------------------------------------------
def _coupler_ref(x_stacked, Ws, bs, Wc, bc, gamma, beta, A):
    h = x_stacked.astype(jnp.float32)
    if A is not None:
        A = jnp.asarray(A, jnp.float32)
        for l in range(Ws.shape[0]):
            y = jnp.einsum("bled,df->blef", h, Ws[l])
            h = jnp.einsum("ef,blfd->bled", A, y) + bs[l][0]
    m = h.mean(axis=2)
    z = m @ Wc + bc[0]
    z = jax.nn.gelu(z, approximate=False)
    mu = z.mean(-1, keepdims=True)
    var = ((z - mu) ** 2).mean(-1, keepdims=True)
    zn = (z - mu) / jnp.sqrt(var + LN_EPS)
    return zn * gamma[0] + beta[0]


def triple_reference(all_expert_outputs, ghost_activation_levels, params, config):
    num_primary = config["num_experts"]
    strategy = config["static_hyperedge_strategy"]
    primary = list(all_expert_outputs[:num_primary])
    ghosts = list(all_expert_outputs[num_primary:])
    levels = np.asarray(ghost_activation_levels, np.float32)
    active_ghosts = [g for g, lv in zip(ghosts, levels) if float(lv) > 0.1]

    def run(p, experts):
        A = build_prop_matrix(len(experts), strategy)
        xs = jnp.stack(experts, axis=2)
        return _coupler_ref(xs, p["Ws"], p["bs"], p["Wc"], p["bc"], p["gamma"], p["beta"], A)

    primary_c = run(params["primary"], primary)
    ghost_c = (run(params["ghost"], active_ghosts)
               if len(active_ghosts) >= 2 else jnp.zeros_like(primary_c))
    all_active = primary + active_ghosts
    mixed_c = (run(params["mixed"], all_active)
               if len(all_active) > num_primary else jnp.zeros_like(primary_c))
    w = jax.nn.softmax(params["coupling_weights"].astype(jnp.float32))
    return w[0] * primary_c + w[1] * ghost_c + w[2] * mixed_c


if __name__ == "__main__":
    config = dict(num_experts=4, num_ghost_experts=2, embed_dim=32, gnn_layers=2,
                  static_hyperedge_strategy="all_pairs")
    B, L, D = 2, 8, config["embed_dim"]
    n_total = config["num_experts"] + config["num_ghost_experts"]

    key = jax.random.PRNGKey(0)
    xkeys = jax.random.split(key, n_total)
    all_expert_outputs = [jax.random.normal(xkeys[i], (B, L, D), jnp.float32)
                          for i in range(n_total)]
    ghost_activation_levels = np.array([0.7, 0.9], np.float32)   # both ghosts active (> 0.1)

    def make_coupler_params(kbase):
        ks = jax.random.split(kbase, 6)
        return dict(
            Ws=jax.random.normal(ks[0], (config["gnn_layers"], D, D), jnp.float32) * 0.1,
            bs=jax.random.normal(ks[1], (config["gnn_layers"], 1, D), jnp.float32) * 0.1,
            Wc=jax.random.normal(ks[2], (D, D), jnp.float32) * 0.1,
            bc=jax.random.normal(ks[3], (1, D), jnp.float32) * 0.1,
            gamma=1.0 + 0.1 * jax.random.normal(ks[4], (1, D), jnp.float32),
            beta=0.1 * jax.random.normal(ks[5], (1, D), jnp.float32),
        )

    kp, kg, km, kw = jax.random.split(jax.random.PRNGKey(1), 4)
    params = dict(
        primary=make_coupler_params(kp),
        ghost=make_coupler_params(kg),
        mixed=make_coupler_params(km),
        coupling_weights=jax.random.normal(kw, (3,), jnp.float32) * 0.3,
        # NOTE: each coupler's learnable `hyperedge_weights` Parameter is never used in forward()
        # (HypergraphConv is called without hyperedge_weight), so it is intentionally omitted.
    )

    out = triple_hypergraph_coupler(all_expert_outputs, ghost_activation_levels, params, config)
    out = jax.block_until_ready(out)

    ref = triple_reference(all_expert_outputs, ghost_activation_levels, params, config)
    assert out.shape == (B, L, D)
    np.testing.assert_allclose(np.asarray(out), np.asarray(ref), atol=3e-4, rtol=3e-4)
    print("KERNEL_OK")
</pallas_src>

<mosaic_0001>
module attributes {stable_mosaic.version = 11 : i64} {
  func.func @kernel(%arg0: i32, %arg1: memref<16x32xf32, #tpu.memory_space<vmem>>, %arg2: memref<16x32xf32, #tpu.memory_space<vmem>>, %arg3: memref<16x32xf32, #tpu.memory_space<vmem>>, %arg4: memref<16x32xf32, #tpu.memory_space<vmem>>, %arg5: memref<16x32xf32, #tpu.memory_space<vmem>>, %arg6: memref<16x32xf32, #tpu.memory_space<vmem>>, %arg7: memref<6x32x96xf32, #tpu.memory_space<vmem>>, %arg8: memref<1x96xf32, #tpu.memory_space<vmem>>, %arg9: memref<96x96xf32, #tpu.memory_space<vmem>>, %arg10: memref<96x32xf32, #tpu.memory_space<vmem>>, %arg11: memref<1x32xf32, #tpu.memory_space<vmem>>, %arg12: memref<16x32xf32, #tpu.memory_space<vmem>>) attributes {dimension_semantics = [#tpu.dimension_semantics<parallel>], iteration_bounds = array<i64: 1>, scalar_prefetch = 0 : i64, scratch_operands = 0 : i64, tpu.core_type = #tpu.core_type<tc>, window_params = [{transform_indices = @transform_0, window_bounds = array<i64: 16, 32>}, {transform_indices = @transform_1, window_bounds = array<i64: 16, 32>}, {transform_indices = @transform_2, window_bounds = array<i64: 16, 32>}, {transform_indices = @transform_3, window_bounds = array<i64: 16, 32>}, {transform_indices = @transform_4, window_bounds = array<i64: 16, 32>}, {transform_indices = @transform_5, window_bounds = array<i64: 16, 32>}, {pipeline_mode = #tpu.pipeline_mode<synchronous>, transform_indices = @transform_6, window_bounds = array<i64: 6, 32, 96>}, {pipeline_mode = #tpu.pipeline_mode<synchronous>, transform_indices = @transform_7, window_bounds = array<i64: 1, 96>}, {pipeline_mode = #tpu.pipeline_mode<synchronous>, transform_indices = @transform_8, window_bounds = array<i64: 96, 96>}, {pipeline_mode = #tpu.pipeline_mode<synchronous>, transform_indices = @transform_9, window_bounds = array<i64: 96, 32>}, {pipeline_mode = #tpu.pipeline_mode<synchronous>, transform_indices = @transform_10, window_bounds = array<i64: 1, 32>}, {transform_indices = @transform_11, window_bounds = array<i64: 16, 32>}]} {
    %c0 = arith.constant 0 : index
    %c0_0 = arith.constant 0 : index
    %0 = vector.load %arg1[%c0, %c0_0] : memref<16x32xf32, #tpu.memory_space<vmem>>, vector<16x32xf32>
    %c0_1 = arith.constant 0 : index
    %c0_2 = arith.constant 0 : index
    %c0_3 = arith.constant 0 : index
    %1 = vector.load %arg7[%c0_1, %c0_2, %c0_3] : memref<6x32x96xf32, #tpu.memory_space<vmem>>, vector<1x32x96xf32>
    %2 = vector.shape_cast %1 : vector<1x32x96xf32> to vector<32x96xf32>
    %cst = arith.constant dense<0.000000e+00> : vector<16x96xf32>
    %3 = tpu.matmul %0, %2, %cst {dimension_numbers = #tpu.dot_dimension_numbers<[1], [0], [0], [1], [0, 0, 1, 1], [], []>} : vector<16x32xf32>, vector<32x96xf32>, vector<16x96xf32> -> vector<16x96xf32>
    %c0_4 = arith.constant 0 : index
    %c0_5 = arith.constant 0 : index
    %4 = vector.load %arg2[%c0_4, %c0_5] : memref<16x32xf32, #tpu.memory_space<vmem>>, vector<16x32xf32>
    %c1 = arith.constant 1 : index
    %c0_6 = arith.constant 0 : index
    %c0_7 = arith.constant 0 : index
    %5 = vector.load %arg7[%c1, %c0_6, %c0_7] : memref<6x32x96xf32, #tpu.memory_space<vmem>>, vector<1x32x96xf32>
    %6 = vector.shape_cast %5 : vector<1x32x96xf32> to vector<32x96xf32>
    %cst_8 = arith.constant dense<0.000000e+00> : vector<16x96xf32>
    %7 = tpu.matmul %4, %6, %cst_8 {dimension_numbers = #tpu.dot_dimension_numbers<[1], [0], [0], [1], [0, 0, 1, 1], [], []>} : vector<16x32xf32>, vector<32x96xf32>, vector<16x96xf32> -> vector<16x96xf32>
    %8 = arith.addf %3, %7 : vector<16x96xf32>
    %c0_9 = arith.constant 0 : index
    %c0_10 = arith.constant 0 : index
    %9 = vector.load %arg3[%c0_9, %c0_10] : memref<16x32xf32, #tpu.memory_space<vmem>>, vector<16x32xf32>
    %c2 = arith.constant 2 : index
    %c0_11 = arith.constant 0 : index
    %c0_12 = arith.constant 0 : index
    %10 = vector.load %arg7[%c2, %c0_11, %c0_12] : memref<6x32x96xf32, #tpu.memory_space<vmem>>, vector<1x32x96xf32>
    %11 = vector.shape_cast %10 : vector<1x32x96xf32> to vector<32x96xf32>
    %cst_13 = arith.constant dense<0.000000e+00> : vector<16x96xf32>
    %12 = tpu.matmul %9, %11, %cst_13 {dimension_numbers = #tpu.dot_dimension_numbers<[1], [0], [0], [1], [0, 0, 1, 1], [], []>} : vector<16x32xf32>, vector<32x96xf32>, vector<16x96xf32> -> vector<16x96xf32>
    %13 = arith.addf %8, %12 : vector<16x96xf32>
    %c0_14 = arith.constant 0 : index
    %c0_15 = arith.constant 0 : index
    %14 = vector.load %arg4[%c0_14, %c0_15] : memref<16x32xf32, #tpu.memory_space<vmem>>, vector<16x32xf32>
    %c3 = arith.constant 3 : index
    %c0_16 = arith.constant 0 : index
    %c0_17 = arith.constant 0 : index
    %15 = vector.load %arg7[%c3, %c0_16, %c0_17] : memref<6x32x96xf32, #tpu.memory_space<vmem>>, vector<1x32x96xf32>
    %16 = vector.shape_cast %15 : vector<1x32x96xf32> to vector<32x96xf32>
    %cst_18 = arith.constant dense<0.000000e+00> : vector<16x96xf32>
    %17 = tpu.matmul %14, %16, %cst_18 {dimension_numbers = #tpu.dot_dimension_numbers<[1], [0], [0], [1], [0, 0, 1, 1], [], []>} : vector<16x32xf32>, vector<32x96xf32>, vector<16x96xf32> -> vector<16x96xf32>
    %18 = arith.addf %13, %17 : vector<16x96xf32>
    %c0_19 = arith.constant 0 : index
    %c0_20 = arith.constant 0 : index
    %19 = vector.load %arg5[%c0_19, %c0_20] : memref<16x32xf32, #tpu.memory_space<vmem>>, vector<16x32xf32>
    %c4 = arith.constant 4 : index
    %c0_21 = arith.constant 0 : index
    %c0_22 = arith.constant 0 : index
    %20 = vector.load %arg7[%c4, %c0_21, %c0_22] : memref<6x32x96xf32, #tpu.memory_space<vmem>>, vector<1x32x96xf32>
    %21 = vector.shape_cast %20 : vector<1x32x96xf32> to vector<32x96xf32>
    %cst_23 = arith.constant dense<0.000000e+00> : vector<16x96xf32>
    %22 = tpu.matmul %19, %21, %cst_23 {dimension_numbers = #tpu.dot_dimension_numbers<[1], [0], [0], [1], [0, 0, 1, 1], [], []>} : vector<16x32xf32>, vector<32x96xf32>, vector<16x96xf32> -> vector<16x96xf32>
    %23 = arith.addf %18, %22 : vector<16x96xf32>
    %c0_24 = arith.constant 0 : index
    %c0_25 = arith.constant 0 : index
    %24 = vector.load %arg6[%c0_24, %c0_25] : memref<16x32xf32, #tpu.memory_space<vmem>>, vector<16x32xf32>
    %c5 = arith.constant 5 : index
    %c0_26 = arith.constant 0 : index
    %c0_27 = arith.constant 0 : index
    %25 = vector.load %arg7[%c5, %c0_26, %c0_27] : memref<6x32x96xf32, #tpu.memory_space<vmem>>, vector<1x32x96xf32>
    %26 = vector.shape_cast %25 : vector<1x32x96xf32> to vector<32x96xf32>
    %cst_28 = arith.constant dense<0.000000e+00> : vector<16x96xf32>
    %27 = tpu.matmul %24, %26, %cst_28 {dimension_numbers = #tpu.dot_dimension_numbers<[1], [0], [0], [1], [0, 0, 1, 1], [], []>} : vector<16x32xf32>, vector<32x96xf32>, vector<16x96xf32> -> vector<16x96xf32>
    %28 = arith.addf %23, %27 : vector<16x96xf32>
    %c0_29 = arith.constant 0 : index
    %c0_30 = arith.constant 0 : index
    %29 = vector.load %arg8[%c0_29, %c0_30] : memref<1x96xf32, #tpu.memory_space<vmem>>, vector<1x96xf32>
    %30 = vector.broadcast %29 : vector<1x96xf32> to vector<16x96xf32>
    %31 = arith.addf %28, %30 : vector<16x96xf32>
    %cst_31 = arith.constant 5.000000e-01 : f32
    %32 = vector.broadcast %cst_31 : f32 to vector<16x96xf32>
    %33 = arith.mulf %32, %31 : vector<16x96xf32>
    %cst_32 = arith.constant 0.707106769 : f32
    %34 = vector.broadcast %cst_32 : f32 to vector<16x96xf32>
    %35 = arith.mulf %31, %34 : vector<16x96xf32>
    %cst_33 = arith.constant 0.000000e+00 : f32
    %36 = vector.broadcast %cst_33 : f32 to vector<16x96xf32>
    %37 = arith.cmpf oge, %35, %36 : vector<16x96xf32>
    %cst_34 = arith.constant 1.000000e+00 : f32
    %cst_35 = arith.constant -1.000000e+00 : f32
    %38 = vector.broadcast %cst_34 : f32 to vector<16x96xf32>
    %39 = vector.broadcast %cst_35 : f32 to vector<16x96xf32>
    %40 = arith.select %37, %38, %39 : vector<16x96xi1>, vector<16x96xf32>
    %41 = math.absf %35 : vector<16x96xf32>
    %cst_36 = arith.constant 0.327591091 : f32
    %42 = vector.broadcast %cst_36 : f32 to vector<16x96xf32>
    %43 = arith.mulf %42, %41 : vector<16x96xf32>
    %cst_37 = arith.constant 1.000000e+00 : f32
    %44 = vector.broadcast %cst_37 : f32 to vector<16x96xf32>
    %45 = arith.addf %44, %43 : vector<16x96xf32>
    %cst_38 = arith.constant 1.000000e+00 : f32
    %46 = vector.broadcast %cst_38 : f32 to vector<16x96xf32>
    %47 = arith.divf %46, %45 : vector<16x96xf32>
    %cst_39 = arith.constant 1.06140542 : f32
    %48 = vector.broadcast %cst_39 : f32 to vector<16x96xf32>
    %49 = arith.mulf %48, %47 : vector<16x96xf32>
    %cst_40 = arith.constant -1.45315206 : f32
    %50 = vector.broadcast %cst_40 : f32 to vector<16x96xf32>
    %51 = arith.addf %49, %50 : vector<16x96xf32>
    %52 = arith.mulf %51, %47 : vector<16x96xf32>
    %cst_41 = arith.constant 1.42141378 : f32
    %53 = vector.broadcast %cst_41 : f32 to vector<16x96xf32>
    %54 = arith.addf %52, %53 : vector<16x96xf32>
    %55 = arith.mulf %54, %47 : vector<16x96xf32>
    %cst_42 = arith.constant -0.284496725 : f32
    %56 = vector.broadcast %cst_42 : f32 to vector<16x96xf32>
    %57 = arith.addf %55, %56 : vector<16x96xf32>
    %58 = arith.mulf %57, %47 : vector<16x96xf32>
    %cst_43 = arith.constant 0.254829586 : f32
    %59 = vector.broadcast %cst_43 : f32 to vector<16x96xf32>
    %60 = arith.addf %58, %59 : vector<16x96xf32>
    %61 = arith.mulf %60, %47 : vector<16x96xf32>
    %cst_44 = arith.constant 0.000000e+00 : f32
    %62 = vector.broadcast %cst_44 : f32 to vector<16x96xf32>
    %63 = arith.subf %62, %41 : vector<16x96xf32>
    %64 = arith.mulf %63, %41 : vector<16x96xf32>
    %65 = math.exp %64 : vector<16x96xf32>
    %66 = arith.mulf %61, %65 : vector<16x96xf32>
    %cst_45 = arith.constant 1.000000e+00 : f32
    %67 = vector.broadcast %cst_45 : f32 to vector<16x96xf32>
    %68 = arith.subf %67, %66 : vector<16x96xf32>
    %69 = arith.mulf %40, %68 : vector<16x96xf32>
    %cst_46 = arith.constant 1.000000e+00 : f32
    %70 = vector.broadcast %cst_46 : f32 to vector<16x96xf32>
    %71 = arith.addf %70, %69 : vector<16x96xf32>
    %72 = arith.mulf %33, %71 : vector<16x96xf32>
    %c0_47 = arith.constant 0 : index
    %c0_48 = arith.constant 0 : index
    %73 = vector.load %arg9[%c0_47, %c0_48] : memref<96x96xf32, #tpu.memory_space<vmem>>, vector<96x96xf32>
    %cst_49 = arith.constant dense<0.000000e+00> : vector<16x96xf32>
    %74 = tpu.matmul %72, %73, %cst_49 {dimension_numbers = #tpu.dot_dimension_numbers<[1], [0], [0], [1], [0, 0, 1, 1], [], []>} : vector<16x96xf32>, vector<96x96xf32>, vector<16x96xf32> -> vector<16x96xf32>
    %75 = arith.subf %72, %74 : vector<16x96xf32>
    %76 = arith.mulf %75, %75 : vector<16x96xf32>
    %c0_50 = arith.constant 0 : index
    %c0_51 = arith.constant 0 : index
    %77 = vector.load %arg9[%c0_50, %c0_51] : memref<96x96xf32, #tpu.memory_space<vmem>>, vector<96x96xf32>
    %cst_52 = arith.constant dense<0.000000e+00> : vector<16x96xf32>
    %78 = tpu.matmul %76, %77, %cst_52 {dimension_numbers = #tpu.dot_dimension_numbers<[1], [0], [0], [1], [0, 0, 1, 1], [], []>} : vector<16x96xf32>, vector<96x96xf32>, vector<16x96xf32> -> vector<16x96xf32>
    %cst_53 = arith.constant 9.99999974E-6 : f32
    %79 = vector.broadcast %cst_53 : f32 to vector<16x96xf32>
    %80 = arith.addf %78, %79 : vector<16x96xf32>
    %81 = math.rsqrt %80 : vector<16x96xf32>
    %82 = arith.mulf %75, %81 : vector<16x96xf32>
    %c0_54 = arith.constant 0 : index
    %c0_55 = arith.constant 0 : index
    %83 = vector.load %arg10[%c0_54, %c0_55] : memref<96x32xf32, #tpu.memory_space<vmem>>, vector<96x32xf32>
    %cst_56 = arith.constant dense<0.000000e+00> : vector<16x32xf32>
    %84 = tpu.matmul %82, %83, %cst_56 {dimension_numbers = #tpu.dot_dimension_numbers<[1], [0], [0], [1], [0, 0, 1, 1], [], []>} : vector<16x96xf32>, vector<96x32xf32>, vector<16x32xf32> -> vector<16x32xf32>
    %c0_57 = arith.constant 0 : index
    %c0_58 = arith.constant 0 : index
    %85 = vector.load %arg11[%c0_57, %c0_58] : memref<1x32xf32, #tpu.memory_space<vmem>>, vector<1x32xf32>
    %86 = vector.broadcast %85 : vector<1x32xf32> to vector<16x32xf32>
    %87 = arith.addf %84, %86 : vector<16x32xf32>
    %c0_59 = arith.constant 0 : index
    %c0_60 = arith.constant 0 : index
    %88 = vector.load %arg12[%c0_59, %c0_60] : memref<16x32xf32, #tpu.memory_space<vmem>>, vector<16x32xf32>
    tpu.vector_store %arg12[%c0_59, %c0_60], %87 {strides = array<i32>} : memref<16x32xf32, #tpu.memory_space<vmem>>, vector<16x32xf32>,
    return
  }
  func.func @transform_0(%arg0: i32) -> (i32, i32) {
    %c0_i32 = arith.constant 0 : i32
    %c0_i32_0 = arith.constant 0 : i32
    return %arg0, %c0_i32 : i32, i32
  }
  func.func @transform_1(%arg0: i32) -> (i32, i32) {
    %c0_i32 = arith.constant 0 : i32
    %c0_i32_0 = arith.constant 0 : i32
    return %arg0, %c0_i32 : i32, i32
  }
  func.func @transform_2(%arg0: i32) -> (i32, i32) {
    %c0_i32 = arith.constant 0 : i32
    %c0_i32_0 = arith.constant 0 : i32
    return %arg0, %c0_i32 : i32, i32
  }
  func.func @transform_3(%arg0: i32) -> (i32, i32) {
    %c0_i32 = arith.constant 0 : i32
    %c0_i32_0 = arith.constant 0 : i32
    return %arg0, %c0_i32 : i32, i32
  }
  func.func @transform_4(%arg0: i32) -> (i32, i32) {
    %c0_i32 = arith.constant 0 : i32
    %c0_i32_0 = arith.constant 0 : i32
    return %arg0, %c0_i32 : i32, i32
  }
  func.func @transform_5(%arg0: i32) -> (i32, i32) {
    %c0_i32 = arith.constant 0 : i32
    %c0_i32_0 = arith.constant 0 : i32
    return %arg0, %c0_i32 : i32, i32
  }
  func.func @transform_6(%arg0: i32) -> (i32, i32, i32) {
    %c0_i32 = arith.constant 0 : i32
    %c0_i32_0 = arith.constant 0 : i32
    %c0_i32_1 = arith.constant 0 : i32
    %c0_i32_2 = arith.constant 0 : i32
    return %c0_i32, %c0_i32_0, %c0_i32_1 : i32, i32, i32
  }
  func.func @transform_7(%arg0: i32) -> (i32, i32) {
    %c0_i32 = arith.constant 0 : i32
    %c0_i32_0 = arith.constant 0 : i32
    %c0_i32_1 = arith.constant 0 : i32
    return %c0_i32, %c0_i32_0 : i32, i32
  }
  func.func @transform_8(%arg0: i32) -> (i32, i32) {
    %c0_i32 = arith.constant 0 : i32
    %c0_i32_0 = arith.constant 0 : i32
    %c0_i32_1 = arith.constant 0 : i32
    return %c0_i32, %c0_i32_0 : i32, i32
  }
  func.func @transform_9(%arg0: i32) -> (i32, i32) {
    %c0_i32 = arith.constant 0 : i32
    %c0_i32_0 = arith.constant 0 : i32
    %c0_i32_1 = arith.constant 0 : i32
    return %c0_i32, %c0_i32_0 : i32, i32
  }
  func.func @transform_10(%arg0: i32) -> (i32, i32) {
    %c0_i32 = arith.constant 0 : i32
    %c0_i32_0 = arith.constant 0 : i32
    %c0_i32_1 = arith.constant 0 : i32
    return %c0_i32, %c0_i32_0 : i32, i32
  }
  func.func @transform_11(%arg0: i32) -> (i32, i32) {
    %c0_i32 = arith.constant 0 : i32
    %c0_i32_0 = arith.constant 0 : i32
    return %arg0, %c0_i32 : i32, i32
  }
}

</mosaic_0001>

<bundles_post_ra>
// kernel: tpu_custom_call.1
= control target key start
LH: loop header
LB: loop body
LE: loop exit
PB: predicated region body
PF: predicated region fallthrough
CT: control target
= control target key end

     0   :  { %16 = vsyncpa [#allocation3], 0  ;;  %s1865_s0 = inlined_call_operand.vmem [shape: f32[16,32], index: 0, kind: input, shape index: {}]   ;;  %s1866_s1 = inlined_call_operand.vmem [shape: f32[16,32], index: 1, kind: input, shape index: {}]   ;;  %s1867_s2 = inlined_call_operand.hbm [shape: f32[16,32], index: 2, kind: input, shape index: {}]   ;;  %s1868_s3 = inlined_call_operand.hbm [shape: f32[16,32], index: 3, kind: input, shape index: {}]   ;;  %s1869_s4 = inlined_call_operand.hbm [shape: f32[16,32], index: 4, kind: input, shape index: {}]   ;;  %s1870_s5 = inlined_call_operand.hbm [shape: f32[16,32], index: 5, kind: input, shape index: {}]   ;;  %s1871_s6 = inlined_call_operand.hbm [shape: f32[6,32,96], index: 6, kind: input, shape index: {}]   ;;  %s1872_s7 = inlined_call_operand.vmem [shape: f32[1,96], index: 7, kind: input, shape index: {}]   ;;  %s1873_s8 = inlined_call_operand.vmem [shape: f32[96,96], index: 8, kind: input, shape index: {}]   ;;  %s1874_s9 = inlined_call_operand.vmem [shape: f32[96,32], index: 9, kind: input, shape index: {}]   ;;  %s1875_s10 = inlined_call_operand.vmem [shape: f32[1,32], index: 10, kind: input, shape index: {}]   ;;  %s1876_s11 = inlined_call_operand.hbm [shape: f32[16,32], index: 11, kind: output, shape index: {}]  }
   0x1   :  { %17 = vsyncpa [#allocation6], 0 }
   0x2   :  { %18 = vsyncpa [#allocation9], 0 }
   0x3   :  { %19 = vsyncpa [#allocation4], 0  ;;  %s1546_s17 = smov [#allocation5]   ;;  %s1547_s19 = smov [#allocation8]  }
   0x4   :  { %s41_s18 = sshll.u32 %s1546_s17, 4  ;;  %s65_s20 = sshll.u32 %s1547_s19, 4  ;;  %s42_s18 = int_to_ptr.vmem [resolvable:$true] %s41_s18  ;;  %s1615_s20 = int_to_ptr.vmem [resolvable:$true] %s65_s20 }
   0x5   :  { %s1406_s23 = scalar_lea.hbm %s1868_s3, 256 }
   0x6   :  { %p1407_p0 = scmp.ne.s32.totalorder %s1868_s3, %s1406_s23  ;;  %p1410_p1 = scmp.lt.u32.totalorder %s1406_s23, %s1868_s3 }
   0x8   :  { %p1412_p2 = pnand %p1410_p1, %p1407_p0 }
   0xa   :  { %1415 = shalt.err (!%p1412_p2)
}
   0xb   :  { %s1416_s28 = scalar_lea.vmem %s42_s18, 256  ;;  %p1421_p4 = scmp.lt.s32.totalorder %s42_s18, %s42_s18 }
   0xc   :  { %p1417_p3 = scmp.ne.s32.totalorder %s42_s18, %s1416_s28  ;;  %p1422_p5 = scmp.lt.s32.totalorder %s1416_s28, %s1416_s28 }
   0xe   :  { %p1423_p6 = por %p1422_p5, %p1421_p4 }
  0x10   :  { %p1424_p7 = pnand %p1423_p6, %p1417_p3 }
  0x12   :  { %1427 = shalt.err (!%p1424_p7)
}
  0x13   :  { %s1548_s29 = smov 128   ;;  %s1549_s30 = smov 8  }
  0x14   :  { %47 = dma.hbm_to_vmem [thread:$0]  %s1868_s3, 256, %s42_s18, [#allocation6], %s1548_s29, %s1548_s29, %s1549_s30  }
  0x15   :  { %s1428_s16 = scalar_lea.hbm %s1870_s5, 256 }
  0x16   :  { %p1429_p8 = scmp.ne.s32.totalorder %s1870_s5, %s1428_s16  ;;  %p1432_p9 = scmp.lt.u32.totalorder %s1428_s16, %s1870_s5 }
  0x18   :  { %p1434_p10 = pnand %p1432_p9, %p1429_p8 }
  0x1a   :  { %1437 = shalt.err (!%p1434_p10)
}
  0x1b   :  { %s1438_s23 = scalar_lea.vmem %s1615_s20, 256  ;;  %p1443_p12 = scmp.lt.s32.totalorder %s1615_s20, %s1615_s20 }
  0x1c   :  { %p1439_p11 = scmp.ne.s32.totalorder %s1615_s20, %s1438_s23  ;;  %p1444_p13 = scmp.lt.s32.totalorder %s1438_s23, %s1438_s23 }
  0x1e   :  { %p1445_p0 = por %p1444_p13, %p1443_p12 }
  0x20   :  { %p1446_p1 = pnand %p1445_p0, %p1439_p11 }
  0x22   :  { %1449 = shalt.err (!%p1446_p1)
}
  0x23   :  { %71 = dma.hbm_to_vmem [thread:$0]  %s1870_s5, 256, %s1615_s20, [#allocation9], %s1548_s29, %s1548_s29, %s1549_s30  }
  0x24   :  { %s1550_s24 = smov [#allocation2]   ;;  %s1551_s26 = smov [#allocation7]  }
  0x25   :  { %s29_s25 = sshll.u32 %s1550_s24, 4  ;;  %s53_s27 = sshll.u32 %s1551_s26, 4  ;;  %s30_s25 = int_to_ptr.vmem [resolvable:$true] %s29_s25  ;;  %s1652_s27 = int_to_ptr.vmem [resolvable:$true] %s53_s27 }
  0x26   :  { %s1450_s13 = scalar_lea.hbm %s1867_s2, 256 }
  0x27   :  { %p1451_p2 = scmp.ne.s32.totalorder %s1867_s2, %s1450_s13  ;;  %p1454_p3 = scmp.lt.u32.totalorder %s1450_s13, %s1867_s2 }
  0x29   :  { %p1456_p4 = pnand %p1454_p3, %p1451_p2 }
  0x2b   :  { %1459 = shalt.err (!%p1456_p4)
}
  0x2c   :  { %s1460_s5 = scalar_lea.vmem %s30_s25, 256  ;;  %p1465_p6 = scmp.lt.s32.totalorder %s30_s25, %s30_s25 }
  0x2d   :  { %p1461_p5 = scmp.ne.s32.totalorder %s30_s25, %s1460_s5  ;;  %p1466_p7 = scmp.lt.s32.totalorder %s1460_s5, %s1460_s5 }
  0x2f   :  { %p1467_p8 = por %p1466_p7, %p1465_p6 }
  0x31   :  { %p1468_p9 = pnand %p1467_p8, %p1461_p5 }
  0x33   :  { %1471 = shalt.err (!%p1468_p9)
}
  0x34   :  { %35 = dma.hbm_to_vmem [thread:$0]  %s1867_s2, 256, %s30_s25, [#allocation3], %s1548_s29, %s1548_s29, %s1549_s30  }
  0x35   :  { %s1472_s23 = scalar_lea.hbm %s1869_s4, 256 }
  0x36   :  { %p1473_p10 = scmp.ne.s32.totalorder %s1869_s4, %s1472_s23  ;;  %p1476_p11 = scmp.lt.u32.totalorder %s1472_s23, %s1869_s4 }
  0x38   :  { %p1478_p12 = pnand %p1476_p11, %p1473_p10 }
  0x3a   :  { %1481 = shalt.err (!%p1478_p12)
}
  0x3b   :  { %s1482_s28 = scalar_lea.vmem %s1652_s27, 256  ;;  %p1487_p0 = scmp.lt.s32.totalorder %s1652_s27, %s1652_s27 }
  0x3c   :  { %p1483_p13 = scmp.ne.s32.totalorder %s1652_s27, %s1482_s28  ;;  %p1488_p1 = scmp.lt.s32.totalorder %s1482_s28, %s1482_s28 }
  0x3e   :  { %p1489_p2 = por %p1488_p1, %p1487_p0 }
  0x40   :  { %p1490_p3 = pnand %p1489_p2, %p1483_p13 }
  0x42   :  { %1493 = shalt.err (!%p1490_p3)
}
  0x43   :  { %59 = dma.hbm_to_vmem [thread:$0]  %s1869_s4, 256, %s1652_s27, [#allocation6], %s1548_s29, %s1548_s29, %s1549_s30  }
  0x44   :  { %s1552_s12 = smov [#allocation10]   ;;  %s1494_s16 = scalar_lea.hbm %s1871_s6, 3072 }
  0x45   :  { %s77_s13 = sshll.u32 %s1552_s12, 4  ;;  %p1495_p4 = scmp.ne.s32.totalorder %s1871_s6, %s1494_s16  ;;  %s78_s13 = int_to_ptr.vmem [resolvable:$true] %s77_s13 }
  0x46   :  { %p1498_p5 = scmp.lt.u32.totalorder %s1494_s16, %s1871_s6 }
  0x48   :  { %p1500_p6 = pnand %p1498_p5, %p1495_p4 }
  0x4a   :  { %1503 = shalt.err (!%p1500_p6)
}
  0x4b   :  { %s1504_s21 = scalar_lea.vmem %s78_s13, 3072  ;;  %p1509_p8 = scmp.lt.s32.totalorder %s78_s13, %s78_s13 }
  0x4c   :  { %p1505_p7 = scmp.ne.s32.totalorder %s78_s13, %s1504_s21  ;;  %p1510_p9 = scmp.lt.s32.totalorder %s1504_s21, %s1504_s21 }
  0x4e   :  { %p1511_p10 = por %p1510_p9, %p1509_p8 }
  0x50   :  { %p1512_p11 = pnand %p1511_p10, %p1505_p7 }
  0x52   :  { %1515 = shalt.err (!%p1512_p11)
}
  0x53   :  { %83 = dma.hbm_to_vmem [thread:$0]  %s1871_s6, 3072, %s78_s13, [#allocation9], %s1548_s29, %s1548_s29, %s1549_s30  }
  0x54   :  { %1538 = dma.done.wait [#allocation3], 256  }
  0x55   :  { %1539 = vsyncadd [#allocation3], 4294967040 }
  0x56   :  { %1540 = dma.done.wait [#allocation6], 512  }
  0x57   :  { %1541 = vsyncadd [#allocation6], 4294966784 }
  0x58   :  { %1542 = dma.done.wait [#allocation9], 3328  }
  0x59   :  { %1543 = vsyncadd [#allocation9], 4294963968  ;;  %vm120_vm0 = vcmask 261120   ;;  %v109_v0 = vld [vmem:[#allocation10] sm:$0xff]  ;;  %v110_v1 = vld [vmem:[#allocation10 + $0x8] sm:$0xff]  ;;  %vm718_vm3 = vcmask 785408  }
  0x5a   :  { %v111_v2 = vld [vmem:[#allocation10 + $0x10] sm:$0xff]  ;;  %v1263_v3 = vpack.c.bf16 %v110_v1, %v109_v0  ;;  %v112_v4 = vld [vmem:[#allocation10 + $0x18] sm:$0xff]  ;;  %v107_v5 = vld [vmem:[%s1865_s0] sm:$0xff]  ;;  %s1554_s28 = smov [#allocation11]  }
  0x5b   :  { %v1267_v6 = vpack.c.bf16 %v112_v4, %v111_v2  ;;  %1127 = vmatprep.mubr.msk.f32.mxu0 %vm120_vm0, %v107_v5  ;;  %v286_v7 = vld [vmem:[#allocation10 + $0x40] sm:$0xff]  ;;  %v287_v8 = vld [vmem:[#allocation10 + $0x48] sm:$0xff]  ;;  %v288_v10 = vld [vmem:[#allocation10 + $0x50] sm:$0xff] }
  0x5c   :  { %1264 = vmatprep.subr.bf16.mxu0 %v1263_v3  ;;  %v1271_v9 = vpack.c.bf16 %v287_v8, %v286_v7  ;;  %v289_v11 = vld [vmem:[#allocation10 + $0x58] sm:$0xff]  ;;  %v116_v12 = vld [vmem:[#allocation10 + $0x20] sm:$0xff]  ;;  %v108_v13 = vld [vmem:[%s1865_s0 + $0x8] sm:$0xff] }
  0x5d   :  { %1266 = vmatpush3.bf16.msra.mxu0 %v1263_v3  ;;  %v117_v14 = vld [vmem:[#allocation10 + $0x28] sm:$0xff]  ;;  %v1275_v15 = vpack.c.bf16 %v289_v11, %v288_v10  ;;  %v283_v16 = vld [vmem:[#allocation2] sm:$0xff]  ;;  %v118_v18 = vld [vmem:[#allocation10 + $0x30] sm:$0xff] }
  0x5e   :  { %1268 = vmatprep.subr.bf16.mxu0 %v1267_v6  ;;  %v1255_v17 = vpack.c.bf16 %v117_v14, %v116_v12  ;;  %v119_v19 = vld [vmem:[#allocation10 + $0x38] sm:$0xff]  ;;  %v376_v20 = vld [vmem:[#allocation10 + $0x60] sm:$0xff]  ;;  %v377_v21 = vld [vmem:[#allocation10 + $0x68] sm:$0xff] }
  0x5f   :  { %v1259_v22 = vpack.c.bf16 %v119_v19, %v118_v18  ;;  %v113_v23 = vld [vmem:[%s1866_s1] sm:$0xff]  ;;  %v1279_v24 = vpack.c.bf16 %v377_v21, %v376_v20  ;;  %v378_v25 = vld [vmem:[#allocation10 + $0x70] sm:$0xff]  ;;  %v379_v26 = vld [vmem:[#allocation10 + $0x78] sm:$0xff] }
  0x60   :  { %1256 = vmatprep.subr.bf16.mxu1 %v1255_v17  ;;  %1116 = vmatprep.mubr.msk.f32.mxu1 %vm120_vm0, %v113_v23  ;;  %v284_v27 = vld [vmem:[#allocation2 + $0x8] sm:$0xff]  ;;  %v1283_v28 = vpack.c.bf16 %v379_v26, %v378_v25  ;;  %v373_v29 = vld [vmem:[#allocation5] sm:$0xff]  ;;  %v466_v30 = vld [vmem:[#allocation10 + $0x80] sm:$0xff] }
  0x61   :  { %1270 = vmatpush3.bf16.msra.mxu0 %v1267_v6  ;;  %1258 = vmatpush3.bf16.msra.mxu1 %v1255_v17  ;;  %v467_v31 = vld [vmem:[#allocation10 + $0x88] sm:$0xff]  ;;  %v468_v34 = vld [vmem:[#allocation10 + $0x90] sm:$0xff]  ;;  %v469_v35 = vld [vmem:[#allocation10 + $0x98] sm:$0xff] }
  0x62   :  { %1272 = vmatprep.subr.bf16.mxu0 %v1271_v9  ;;  %1260 = vmatprep.subr.bf16.mxu1 %v1259_v22  ;;  %v114_v32 = vld [vmem:[%s1866_s1 + $0x8] sm:$0xff]  ;;  %v1287_v33 = vpack.c.bf16 %v467_v31, %v466_v30  ;;  %v374_v36 = vld [vmem:[#allocation5 + $0x8] sm:$0xff]  ;;  %v1291_v37 = vpack.c.bf16 %v469_v35, %v468_v34  ;;  %v463_v38 = vld [vmem:[#allocation7] sm:$0xff] }
  0x63   :  { %v556_v39 = vld [vmem:[#allocation10 + $0xa0] sm:$0xff]  ;;  %v557_v40 = vld [vmem:[#allocation10 + $0xa8] sm:$0xff]  ;;  %v558_v42 = vld [vmem:[#allocation10 + $0xb0] sm:$0xff] }
  0x64   :  { %1128 = vmatmul.mubr.msk.f32.vlgmr.msra.gmra.mrb[0].mxu0 %vm120_vm0, %v108_v13  ;;  %v1295_v41 = vpack.c.bf16 %v557_v40, %v556_v39  ;;  %v559_v43 = vld [vmem:[#allocation10 + $0xb8] sm:$0xff]  ;;  %v464_v44 = vld [vmem:[#allocation7 + $0x8] sm:$0xff]  ;;  %v553_v46 = vld [vmem:[#allocation8] sm:$0xff] }
  0x65   :  { %1274 = vmatpush3.bf16.msra.mxu0 %v1271_v9  ;;  %1138 = vmatprep.mubr.msk.f32.mxu0 %vm120_vm0, %v283_v16  ;;  %v1299_v45 = vpack.c.bf16 %v559_v43, %v558_v42  ;;  %v554_v47 = vld [vmem:[#allocation8 + $0x8] sm:$0xff]  ;;  %v706_v48 = vld [vmem:[%s1873_s8] sm:$0xff]  ;;  %v707_v49 = vld [vmem:[%s1873_s8 + $0x8] sm:$0xff] }
  0x66   :  { %1276 = vmatprep.subr.bf16.mxu0 %v1275_v15  ;;  %1262 = vmatpush3.bf16.msra.mxu1 %v1259_v22  ;;  %v1734_v50 = vpack.c.bf16 %v707_v49, %v706_v48  ;;  %v708_v51 = vld [vmem:[%s1873_s8 + $0x10] sm:$0xff]  ;;  %v709_v52 = vld [vmem:[%s1873_s8 + $0x18] sm:$0xff]  ;;  %v710_v54 = vld [vmem:[%s1873_s8 + $0x20] sm:$0xff] }
  0x67   :  { %v1744_v53 = vpack.c.bf16 %v709_v52, %v708_v51  ;;  %v711_v55 = vld [vmem:[%s1873_s8 + $0x28] sm:$0xff]  ;;  %v712_v57 = vld [vmem:[%s1873_s8 + $0x30] sm:$0xff]  ;;  %v713_v58 = vld [vmem:[%s1873_s8 + $0x38] sm:$0xff]  ;;  %v1553_v51 = vmov -1.0  }
  0x68   :  { %1304 = vmatprep.subr.bf16.mxu1 %v1734_v50  ;;  %v1754_v56 = vpack.c.bf16 %v711_v55, %v710_v54  ;;  %v1764_v59 = vpack.c.bf16 %v713_v58, %v712_v57  ;;  %v714_v60 = vld [vmem:[%s1873_s8 + $0x40] sm:$0xff]  ;;  %v715_v61 = vld [vmem:[%s1873_s8 + $0x48] sm:$0xff]  ;;  %v716_v63 = vld [vmem:[%s1873_s8 + $0x50] sm:$0xff] }
  0x69   :  { %1278 = vmatpush3.bf16.msra.mxu0 %v1275_v15  ;;  %1117 = vmatmul.mubr.msk.f32.vlgmr.msra.gmra.mrb[0].mxu1 %vm120_vm0, %v114_v32  ;;  %v1774_v62 = vpack.c.bf16 %v715_v61, %v714_v60  ;;  %v717_v0 = vld [vmem:[%s1873_s8 + $0x58] sm:$0xff]  ;;  %v1022_v5 = vld [vmem:[%s1872_s7] ss:$0 sm:$0xff]  ;;  %s996_s7 = sshll.u32 %s1554_s28, 4  ;;  %s997_s7 = int_to_ptr.vmem [resolvable:$true] %s996_s7 }
  0x6a   :  { %1280 = vmatprep.subr.bf16.mxu0 %v1279_v24  ;;  %1306 = vmatpush3.bf16.msra.mxu1 %v1734_v50  ;;  %v1784_v1 = vpack.c.bf16 %v717_v0, %v716_v63  ;;  %s1516_s8 = scalar_lea.vmem %s997_s7, 256  ;;  %p1521_p13 = scmp.lt.s32.totalorder %s997_s7, %s997_s7 }
  0x6b   :  { %1308 = vmatprep.subr.bf16.mxu1 %v1744_v53  ;;  %p1517_p12 = scmp.ne.s32.totalorder %s997_s7, %s1516_s8  ;;  %p1522_p0 = scmp.lt.s32.totalorder %s1516_s8, %s1516_s8 }
  0x6c   :  { %1139 = vmatmul.mubr.msk.f32.vlgmr.msra.gmra.mrb[0].mxu0 %vm120_vm0, %v284_v27 }
  0x6d   :  { %1282 = vmatpush3.bf16.msra.mxu0 %v1279_v24  ;;  %1149 = vmatprep.mubr.msk.f32.mxu0 %vm120_vm0, %v373_v29  ;;  %p1523_p1 = por %p1522_p0, %p1521_p13 }
  0x6e   :  { %1284 = vmatprep.subr.bf16.mxu0 %v1283_v28  ;;  %1310 = vmatpush3.bf16.msra.mxu1 %v1744_v53 }
  0x6f   :  { %1312 = vmatprep.subr.bf16.mxu1 %v1754_v56  ;;  %p1524_p2 = pnand %p1523_p1, %p1517_p12 }
  0x71   :  { %1286 = vmatpush3.bf16.msra.mxu0 %v1283_v28 }
  0x72   :  { %1288 = vmatprep.subr.bf16.mxu0 %v1287_v33  ;;  %1314 = vmatpush3.bf16.msra.mxu1 %v1754_v56 }
  0x73   :  { %1316 = vmatprep.subr.bf16.mxu1 %v1764_v59 }
  0x74   :  { %1150 = vmatmul.mubr.msk.f32.vlgmr.msra.gmra.mrb[0].mxu0 %vm120_vm0, %v374_v36 }
  0x75   :  { %1290 = vmatpush3.bf16.msra.mxu0 %v1287_v33  ;;  %1160 = vmatprep.mubr.msk.f32.mxu0 %vm120_vm0, %v463_v38 }
  0x76   :  { %1292 = vmatprep.subr.bf16.mxu0 %v1291_v37  ;;  %1318 = vmatpush3.bf16.msra.mxu1 %v1764_v59 }
  0x77   :  { %1320 = vmatprep.subr.bf16.mxu1 %v1774_v62 }
  0x79   :  { %1294 = vmatpush3.bf16.msra.mxu0 %v1291_v37 }
  0x7a   :  { %1296 = vmatprep.subr.bf16.mxu0 %v1295_v41  ;;  %1322 = vmatpush3.bf16.msra.mxu1 %v1774_v62 }
  0x7b   :  { %1324 = vmatprep.subr.bf16.mxu1 %v1784_v1 }
  0x7c   :  { %1161 = vmatmul.mubr.msk.f32.vlgmr.msra.gmra.mrb[0].mxu0 %vm120_vm0, %v464_v44 }
  0x7d   :  { %1298 = vmatpush3.bf16.msra.mxu0 %v1295_v41  ;;  %1171 = vmatprep.mubr.msk.f32.mxu0 %vm120_vm0, %v553_v46 }
  0x7e   :  { %1300 = vmatprep.subr.bf16.mxu0 %v1299_v45  ;;  %1326 = vmatpush3.bf16.msra.mxu1 %v1784_v1 }
  0x7f   :  { %1328 = vmatprep.subr.bf16.mxu1 %v1734_v50 }
  0x81   :  { %1302 = vmatpush3.bf16.msra.mxu0 %v1299_v45 }
  0x84   :  { %1172 = vmatmul.mubr.msk.f32.vlgmr.msra.gmra.mrb[0].mxu0 %vm120_vm0, %v554_v47 }
 0x13c   :  { %v1118_v2 = vpop.f32.mrb[0].mxu1 }
 0x13d   :  { %v193_v3 = vpop.f32.mrb[1].mxu1 }
 0x157   :  { %v1173_v4 = vpop.f32.mrb[0].mxu0 }
 0x158   :  { %v1375_v6 = vadd.f32 %v1173_v4, %v1118_v2  ;;  %v632_v7 = vpop.f32.mrb[1].mxu0 }
 0x159   :  { %v1376_v8 = vadd.f32 %v632_v7, %v193_v3 }
 0x15a   :  { %v651_v9 = vadd.f32 %v1375_v6, %v1022_v5 }
 0x15b   :  { %v650_v10 = vadd.f32 %v1376_v8, %v1022_v5 }
 0x15c   :  { %v655_v11 = vmul.f32 0.70710677, %v651_v9  ;;  %v653_v0 = vmul.f32 0.5, %v651_v9 }
 0x15d   :  { %v654_v12 = vmul.f32 0.70710677, %v650_v10  ;;  %v652_v61 = vmul.f32 0.5, %v650_v10  ;;  %v893_v10 = vld [vmem:[%s1874_s9 + $0x20] sm:$0xff] }
 0x15e   :  { %v661_v13 = vand.u32 2147483647, %v655_v11  ;;  %vm657_vm1 = vcmp.ge.f32.partialorder %v655_v11, 0.0  ;;  %v894_v11 = vld [vmem:[%s1874_s9 + $0x28] sm:$0xff] }
 0x15f   :  { %v660_v14 = vand.u32 2147483647, %v654_v12  ;;  %vm656_vm2 = vcmp.ge.f32.partialorder %v654_v12, 0.0  ;;  %v659_v52 = vsel %vm657_vm1, 1.0, %v1553_v51  ;;  %v1359_v12 = vpack.c.bf16 %v894_v11, %v893_v10 }
 0x160   :  { %v663_v15 = vmul.f32 0.3275911, %v661_v13  ;;  %v689_v19 = vsub.f32 0.0, %v661_v13  ;;  %v658_v57 = vsel %vm656_vm2, 1.0, %v1553_v51 }
 0x161   :  { %v662_v16 = vmul.f32 0.3275911, %v660_v14  ;;  %v688_v20 = vsub.f32 0.0, %v660_v14 }
 0x162   :  { %v665_v17 = vadd.f32 1.0, %v663_v15  ;;  %v691_v22 = vmul.f32 %v689_v19, %v661_v13  ;;  %v895_v13 = vld [vmem:[%s1874_s9 + $0x30] sm:$0xff] }
 0x163   :  { %v664_v18 = vadd.f32 1.0, %v662_v16  ;;  %v690_v25 = vmul.f32 %v688_v20, %v660_v14  ;;  %v896_v14 = vld [vmem:[%s1874_s9 + $0x38] sm:$0xff]  ;;  %v897_v16 = vld [vmem:[%s1874_s9 + $0x40] sm:$0xff]  ;;  %v899_v19 = vld [vmem:[%s1874_s9 + $0x50] sm:$0xff] }
 0x164   :  { %1394 = vrcp.f32 %v665_v17  ;;  %v694_v28 = vmul.f32 1.442695, %v691_v22  ;;  %v1363_v15 = vpack.c.bf16 %v896_v14, %v895_v13  ;;  %v898_v17 = vld [vmem:[%s1874_s9 + $0x48] sm:$0xff]  ;;  %v900_v20 = vld [vmem:[%s1874_s9 + $0x58] sm:$0xff] }
 0x165   :  { %1396 = vrcp.f32 %v664_v18  ;;  %v692_v31 = vmul.f32 1.442695, %v690_v25  ;;  %v1367_v18 = vpack.c.bf16 %v898_v17, %v897_v16 }
 0x166   :  { %1398 = vpow2.f32 %v694_v28 }
 0x167   :  { %1400 = vpow2.f32 %v692_v31 }
 0x16e   :  { %v1395_v21 = vpop.eup %1394 }
 0x16f   :  { %v1397_v23 = vpop.eup %1396  ;;  %v671_v24 = vmul.f32 1.0614054, %v1395_v21 }
 0x170   :  { %v670_v26 = vmul.f32 1.0614054, %v1397_v23  ;;  %v1399_v44 = vpop.eup %1398 }
 0x171   :  { %v673_v27 = vadd.f32 -1.4531521, %v671_v24  ;;  %v1401_v46 = vpop.eup %1400 }
 0x172   :  { %v672_v29 = vadd.f32 -1.4531521, %v670_v26 }
 0x173   :  { %v675_v30 = vmul.f32 %v1395_v21, %v673_v27 }
 0x174   :  { %v674_v32 = vmul.f32 %v1397_v23, %v672_v29 }
 0x175   :  { %v677_v33 = vadd.f32 1.4214138, %v675_v30  ;;  %v1027_v30 = vld [vmem:[%s1875_s10] ss:$0 sm:$0xff] }
 0x176   :  { %v676_v34 = vadd.f32 1.4214138, %v674_v32 }
 0x177   :  { %v679_v35 = vmul.f32 %v1395_v21, %v677_v33 }
 0x178   :  { %v678_v36 = vmul.f32 %v1397_v23, %v676_v34 }
 0x179   :  { %v681_v37 = vadd.f32 -0.28449672, %v679_v35 }
 0x17a   :  { %v680_v38 = vadd.f32 -0.28449672, %v678_v36 }
 0x17b   :  { %v683_v39 = vmul.f32 %v1395_v21, %v681_v37 }
 0x17c   :  { %v682_v40 = vmul.f32 %v1397_v23, %v680_v38 }
 0x17d   :  { %v685_v41 = vadd.f32 0.2548296, %v683_v39 }
 0x17e   :  { %v684_v42 = vadd.f32 0.2548296, %v682_v40 }
 0x17f   :  { %v687_v43 = vmul.f32 %v1395_v21, %v685_v41  ;;  %v1371_v21 = vpack.c.bf16 %v900_v20, %v899_v19 }
 0x180   :  { %v686_v45 = vmul.f32 %v1397_v23, %v684_v42 }
 0x181   :  { %v697_v47 = vmul.f32 %v1399_v44, %v687_v43 }
 0x182   :  { %v696_v48 = vmul.f32 %v1401_v46, %v686_v45 }
 0x183   :  { %v699_v49 = vsub.f32 1.0, %v697_v47 }
 0x184   :  { %v698_v54 = vsub.f32 1.0, %v696_v48 }
 0x185   :  { %v701_v55 = vmul.f32 %v699_v49, %v659_v52 }
 0x186   :  { %v700_v58 = vmul.f32 %v698_v54, %v658_v57 }
 0x187   :  { %v703_v60 = vadd.f32 1.0, %v701_v55 }
 0x188   :  { %v702_v63 = vadd.f32 1.0, %v700_v58 }
 0x189   :  { %v705_v3 = vmul.f32 %v703_v60, %v653_v0 }
 0x18a   :  { %v704_v2 = vmul.f32 %v702_v63, %v652_v61 }
 0x18c   :  { %1198 = vmatprep.mubr.msk.f32.mxu1 %vm718_vm3, %v704_v2 }
 0x18d   :  { %1199 = vmatmul.mubr.msk.f32.vlgmr.msra.gmra.mrb[2].mxu1 %vm718_vm3, %v705_v3 }
 0x18e   :  { %1330 = vmatpush3.bf16.msra.mxu1 %v1734_v50  ;;  %v889_v50 = vld [vmem:[%s1874_s9] sm:$0xff] }
 0x18f   :  { %1332 = vmatprep.subr.bf16.mxu1 %v1744_v53 }
 0x192   :  { %1334 = vmatpush3.bf16.msra.mxu1 %v1744_v53  ;;  %v890_v53 = vld [vmem:[%s1874_s9 + $0x8] sm:$0xff] }
 0x193   :  { %1336 = vmatprep.subr.bf16.mxu1 %v1754_v56 }
 0x196   :  { %1338 = vmatpush3.bf16.msra.mxu1 %v1754_v56  ;;  %v891_v56 = vld [vmem:[%s1874_s9 + $0x10] sm:$0xff] }
 0x197   :  { %1340 = vmatprep.subr.bf16.mxu1 %v1764_v59 }
 0x19a   :  { %1342 = vmatpush3.bf16.msra.mxu1 %v1764_v59  ;;  %v1351_v59 = vpack.c.bf16 %v890_v53, %v889_v50 }
 0x19b   :  { %1344 = vmatprep.subr.bf16.mxu1 %v1774_v62 }
 0x19c   :  { %1352 = vmatprep.subr.bf16.mxu0 %v1351_v59 }
 0x19d   :  { %1354 = vmatpush3.bf16.msra.mxu0 %v1351_v59 }
 0x19e   :  { %1346 = vmatpush3.bf16.msra.mxu1 %v1774_v62  ;;  %v892_v62 = vld [vmem:[%s1874_s9 + $0x18] sm:$0xff] }
 0x19f   :  { %1348 = vmatprep.subr.bf16.mxu1 %v1784_v1  ;;  %v1355_v4 = vpack.c.bf16 %v892_v62, %v891_v56 }
 0x1a1   :  { %1356 = vmatprep.subr.bf16.mxu0 %v1355_v4 }
 0x1a2   :  { %1350 = vmatpush3.bf16.msra.mxu1 %v1784_v1  ;;  %1358 = vmatpush3.bf16.msra.mxu0 %v1355_v4 }
 0x1a3   :  { %1360 = vmatprep.subr.bf16.mxu0 %v1359_v12 }
 0x1a6   :  { %1362 = vmatpush3.bf16.msra.mxu0 %v1359_v12 }
 0x1a7   :  { %1364 = vmatprep.subr.bf16.mxu0 %v1363_v15 }
 0x1aa   :  { %1366 = vmatpush3.bf16.msra.mxu0 %v1363_v15 }
 0x1ab   :  { %1368 = vmatprep.subr.bf16.mxu0 %v1367_v18 }
 0x1ae   :  { %1370 = vmatpush3.bf16.msra.mxu0 %v1367_v18 }
 0x1af   :  { %1372 = vmatprep.subr.bf16.mxu0 %v1371_v21 }
 0x1b2   :  { %1374 = vmatpush3.bf16.msra.mxu0 %v1371_v21 }
 0x260   :  { %v1200_v1 = vpop.f32.mrb[2].mxu1 }
 0x261   :  { %v801_v5 = vsub.f32 %v705_v3, %v1200_v1  ;;  %v791_v6 = vpop.f32.mrb[3].mxu1 }
 0x262   :  { %v800_v7 = vsub.f32 %v704_v2, %v791_v6 }
 0x263   :  { %v803_v9 = vmul.f32 %v801_v5, %v801_v5 }
 0x264   :  { %v802_v8 = vmul.f32 %v800_v7, %v800_v7 }
 0x266   :  { %1225 = vmatprep.mubr.msk.f32.mxu1 %vm718_vm3, %v802_v8 }
 0x267   :  { %1226 = vmatmul.mubr.msk.f32.vlgmr.msra.gmra.mrb[4].mxu1 %vm718_vm3, %v803_v9 }
 0x33a   :  { %v1227_v22 = vpop.f32.mrb[4].mxu1 }
 0x33b   :  { %v882_v23 = vadd.f32 1e-05, %v1227_v22  ;;  %v876_v24 = vpop.f32.mrb[5].mxu1 }
 0x33c   :  { %v877_v25 = vadd.f32 1e-05, %v876_v24 }
 0x33d   :  { %1402 = vrsqrt.f32 %v882_v23 }
 0x33e   :  { %1404 = vrsqrt.f32 %v877_v25 }
 0x347   :  { %v1403_v26 = vpop.eup %1402 }
 0x348   :  { %v1405_v27 = vpop.eup %1404  ;;  %v888_v29 = vmul.f32 %v1403_v26, %v801_v5 }
 0x349   :  { %v887_v28 = vmul.f32 %v1405_v27, %v800_v7 }
 0x34b   :  { %1252 = vmatprep.mubr.msk.f32.mxu0 %vm718_vm3, %v887_v28 }
 0x34c   :  { %1253 = vmatmul.mubr.msk.f32.vlgmr.msra.gmra.mrb[2].mxu0 %vm718_vm3, %v888_v29 }
 0x41f   :  { %v1254_v31 = vpop.f32.mrb[2].mxu0 }
 0x420   :  { %v986_v32 = vadd.f32 %v1254_v31, %v1027_v30  ;;  %v980_v33 = vpop.f32.mrb[3].mxu0 }
 0x421   :  { %v981_v34 = vadd.f32 %v1027_v30, %v980_v33 }
 0x422   :  { %990 = vst.msk [vmem:[#allocation11 + $0x8] sm:$0xff] %vm120_vm0, %v986_v32 }
 0x423   :  { %989 = vst.msk [vmem:[#allocation11] sm:$0xff] %vm120_vm0, %v981_v34 }
 0x424   :  { %1527 = shalt.err (!%p1524_p2)
}
 0x425   :  { %s1528_s25 = scalar_lea.hbm %s1876_s11, 256 }
 0x426   :  { %p1529_p3 = scmp.ne.s32.totalorder %s1876_s11, %s1528_s25  ;;  %p1532_p4 = scmp.lt.u32.totalorder %s1528_s25, %s1876_s11 }
 0x428   :  { %p1534_p5 = pnand %p1532_p4, %p1529_p3 }
 0x42a   :  { %1537 = shalt.err (!%p1534_p5)
}
 0x42b   :  { %1002 = dma.vmem_to_hbm [thread:$0]  %s997_s7, 256, %s1876_s11, [#allocation4], %s1548_s29, %s1548_s29, %s1549_s30  }
 0x42c   :  { %1544 = dma.done.wait [#allocation4], 256  }
 0x42d   :  { %1545 = vsyncadd [#allocation4], 4294967040 }
 0x42e   :  { %1006 = vsyncpa [#allocation3], 1 }
 0x42f   :  { %1007 = vsyncpa [#allocation6], 1 }
 0x430   :  { %1008 = vsyncpa [#allocation9], 1 }
 0x431   :  { %1009 = vsyncpa [#allocation4], 1 }

</bundles_post_ra>
